<compile_context>
chip_gen: v7x
topology: tpu7x:2x2x1
jax: 0.10.0
libtpu: 0.0.40
codegen_flags: <defaults>
</compile_context>

<pallas_src>
import functools

import jax
import jax.numpy as jnp
from jax.experimental import pallas as pl
from jax.experimental.pallas import tpu as pltpu

_SUBLANE = 8
_LANE = 128


def _round_up(x, m):
    return ((x + m - 1) // m) * m


def _vmem_budget():
    """Generation-aware scoped-VMEM budget (~half of physical VMEM)."""
    try:
        phys = getattr(pltpu.get_tpu_info(), "vmem_capacity_bytes", None)
        if not phys:
            raise ValueError("no vmem info")
        return int(min(max(phys // 2, 32 * 1024 * 1024), 96 * 1024 * 1024))
    except Exception:
        return 32 * 1024 * 1024  # safe on every generation (incl. v7x, 64 MiB)


def _pick_batch_tile(batch, d, x_itemsize, lane1_streams, vmem_budget):
    """Largest multiple-of-8 row tile such that (a) one lane-padded X buffer is
    ~4 MiB and (b) all double-buffered streams fit the scoped VMEM budget.

    Lane padding accounted for: an X row occupies round_up(D,128)*itemsize
    bytes in VMEM; every (tb, 1) y / y_hat block pads its lane dim to 128.
    """
    d_pad = _round_up(max(d, 1), _LANE)
    x_row = d_pad * x_itemsize
    per_row = 2 * x_row + lane1_streams * 2 * _LANE * 4  # double-buffered
    headroom = 2 * 1024 * 1024                            # resident w, partials
    target_rows = (4 * 1024 * 1024) // x_row
    cap_rows = max(_SUBLANE, (vmem_budget - headroom) // per_row)
    tb = max(_SUBLANE, min(target_rows, cap_rows))
    tb = (tb // _SUBLANE) * _SUBLANE
    if tb >= 512:          # prefer 512-row multiples: unmasked packed stores (v5e)
        tb = (tb // 512) * 512
    tb = min(tb, _round_up(batch, _SUBLANE))
    return max(_SUBLANE, tb)


# ---------------------------------------------------------------------------
# Kernel bodies
# ---------------------------------------------------------------------------
def _predict(x_ref, w_ref, b_ref):
    # VPU/XLU formulation of (TB, D) @ (D, 1): w is a lane-dense (1, D) row,
    # so the N=1 "matmul" never pays MXU push/pop latency and w's lane-padded
    # VMEM footprint stays tiny.  f32 accumulation regardless of X dtype.
    x = x_ref[...].astype(jnp.float32)
    wr = w_ref[...].astype(jnp.float32)
    return jnp.sum(x * wr, axis=-1, keepdims=True) + b_ref[0]


def _masked_sq_err(yhat, y_ref, i, tb, batch):
    diff = yhat - y_ref[...].astype(jnp.float32)
    row = i * tb + jax.lax.broadcasted_iota(jnp.int32, diff.shape, 0)
    diff = jnp.where(row < batch, diff, 0.0)   # mask padded tail rows
    return jnp.sum(diff * diff)


def _fwd_kernel(x_ref, w_ref, b_ref, yhat_ref):
    yhat_ref[...] = _predict(x_ref, w_ref, b_ref).astype(yhat_ref.dtype)


def _loss_kernel(x_ref, w_ref, y_ref, b_ref, part_ref, *, batch, tb):
    i = pl.program_id(0)
    sq = _masked_sq_err(_predict(x_ref, w_ref, b_ref), y_ref, i, tb, batch)
    part_ref[...] = jnp.broadcast_to(sq, part_ref.shape)


def _fwd_loss_kernel(x_ref, w_ref, y_ref, b_ref, yhat_ref, part_ref, *, batch, tb):
    i = pl.program_id(0)
    yhat = _predict(x_ref, w_ref, b_ref)
    yhat_ref[...] = yhat.astype(yhat_ref.dtype)
    sq = _masked_sq_err(yhat, y_ref, i, tb, batch)
    part_ref[...] = jnp.broadcast_to(sq, part_ref.shape)


def _mse_kernel(h_ref, y_ref, part_ref, *, rows, tm):
    i = pl.program_id(0)
    d = h_ref[...].astype(jnp.float32) - y_ref[...].astype(jnp.float32)
    r = i * tm + jax.lax.broadcasted_iota(jnp.int32, d.shape, 0)
    d = jnp.where(r < rows, d, 0.0)
    part_ref[...] = jnp.broadcast_to(jnp.sum(d * d), part_ref.shape)


# ---------------------------------------------------------------------------
# Wrappers
# ---------------------------------------------------------------------------
def _prep_params(X, w, b):
    D = X.shape[1]
    w_row = jnp.asarray(w, jnp.float32).reshape(1, D)   # lane-dense resident w
    b1 = jnp.asarray(b, jnp.float32).reshape(1)
    return w_row, b1


def linear_regression_forward(X, w, b):
    """y_hat = X @ w + b, returned as (B, 1) for PyTorch parity.
    X may be float32 or bfloat16 (f32 accumulation either way)."""
    B, D = X.shape
    budget = _vmem_budget()
    tb = _pick_batch_tile(B, D, X.dtype.itemsize, lane1_streams=1,
                          vmem_budget=budget)
    nt = pl.cdiv(B, tb)
    w_row, b1 = _prep_params(X, w, b)
    return pl.pallas_call(
        _fwd_kernel,
        out_shape=jax.ShapeDtypeStruct((B, 1), jnp.float32),
        grid=(nt,),
        in_specs=[
            pl.BlockSpec((tb, D), lambda i: (i, 0)),   # X streamed over batch
            pl.BlockSpec((1, D), lambda i: (0, 0)),    # w resident, lane-dense
            pl.BlockSpec(memory_space=pltpu.SMEM),     # b scalar
        ],
        out_specs=pl.BlockSpec((tb, 1), lambda i: (i, 0)),
        compiler_params=pltpu.CompilerParams(
            dimension_semantics=("parallel",),
            vmem_limit_bytes=budget,
        ),
        cost_estimate=pl.CostEstimate(
            flops=2 * B * D, transcendentals=0,
            bytes_accessed=X.dtype.itemsize * B * D + 4 * (D + B),
        ),
    )(X, w_row, b1)


def linear_regression_loss(X, w, b, y):
    """mean((X @ w + b - y)**2) without materializing y_hat in HBM."""
    B, D = X.shape
    budget = _vmem_budget()
    tb = _pick_batch_tile(B, D, X.dtype.itemsize, lane1_streams=1,
                          vmem_budget=budget)
    nt = pl.cdiv(B, tb)
    w_row, b1 = _prep_params(X, w, b)
    parts = pl.pallas_call(
        functools.partial(_loss_kernel, batch=B, tb=tb),
        out_shape=jax.ShapeDtypeStruct((nt, _SUBLANE, _LANE), jnp.float32),
        grid=(nt,),
        in_specs=[
            pl.BlockSpec((tb, D), lambda i: (i, 0)),
            pl.BlockSpec((1, D), lambda i: (0, 0)),
            pl.BlockSpec((tb, 1), lambda i: (i, 0)),
            pl.BlockSpec(memory_space=pltpu.SMEM),
        ],
        # per-tile partials -> no cross-tile carry -> megacore-shardable grid
        out_specs=pl.BlockSpec((1, _SUBLANE, _LANE), lambda i: (i, 0, 0)),
        compiler_params=pltpu.CompilerParams(
            dimension_semantics=("parallel",),
            vmem_limit_bytes=budget,
        ),
        cost_estimate=pl.CostEstimate(
            flops=2 * B * D + 3 * B, transcendentals=0,
            bytes_accessed=X.dtype.itemsize * B * D
            + y.dtype.itemsize * B + 4 * D,
        ),
    )(X, w_row, y, b1)
    return jnp.sum(parts[:, 0, 0]) / jnp.float32(B)


def linear_regression_forward_and_loss(X, w, b, y):
    """Single streaming pass over X returning (y_hat, mse_loss)."""
    B, D = X.shape
    budget = _vmem_budget()
    tb = _pick_batch_tile(B, D, X.dtype.itemsize, lane1_streams=2,
                          vmem_budget=budget)
    nt = pl.cdiv(B, tb)
    w_row, b1 = _prep_params(X, w, b)
    y_hat, parts = pl.pallas_call(
        functools.partial(_fwd_loss_kernel, batch=B, tb=tb),
        out_shape=(
            jax.ShapeDtypeStruct((B, 1), jnp.float32),
            jax.ShapeDtypeStruct((nt, _SUBLANE, _LANE), jnp.float32),
        ),
        grid=(nt,),
        in_specs=[
            pl.BlockSpec((tb, D), lambda i: (i, 0)),
            pl.BlockSpec((1, D), lambda i: (0, 0)),
            pl.BlockSpec((tb, 1), lambda i: (i, 0)),
            pl.BlockSpec(memory_space=pltpu.SMEM),
        ],
        out_specs=(
            pl.BlockSpec((tb, 1), lambda i: (i, 0)),
            pl.BlockSpec((1, _SUBLANE, _LANE), lambda i: (i, 0, 0)),
        ),
        compiler_params=pltpu.CompilerParams(
            dimension_semantics=("parallel",),
            vmem_limit_bytes=budget,
        ),
        cost_estimate=pl.CostEstimate(
            flops=2 * B * D + 3 * B, transcendentals=0,
            bytes_accessed=X.dtype.itemsize * B * D + 8 * B + 4 * D,
        ),
    )(X, w_row, y, b1)
    return y_hat, jnp.sum(parts[:, 0, 0]) / jnp.float32(B)


def mse_loss(y_hat, y):
    """Standalone MSE (module.loss parity).  No wrapper-side pad/reshape
    materialization: free reshape to lane-dense (rows, 128) when n % 128 == 0,
    otherwise (n, 1); ragged tail handled in-kernel with an iota mask."""
    n = int(y_hat.size)
    cols = _LANE if n % _LANE == 0 else 1
    rows = n // cols
    h = jnp.reshape(y_hat, (rows, cols))
    t = jnp.reshape(y, (rows, cols))
    tm = min(4096, _round_up(rows, _SUBLANE))
    nt = pl.cdiv(rows, tm)
    budget = _vmem_budget()
    parts = pl.pallas_call(
        functools.partial(_mse_kernel, rows=rows, tm=tm),
        out_shape=jax.ShapeDtypeStruct((nt, _SUBLANE, _LANE), jnp.float32),
        grid=(nt,),
        in_specs=[
            pl.BlockSpec((tm, cols), lambda i: (i, 0)),
            pl.BlockSpec((tm, cols), lambda i: (i, 0)),
        ],
        out_specs=pl.BlockSpec((1, _SUBLANE, _LANE), lambda i: (i, 0, 0)),
        compiler_params=pltpu.CompilerParams(
            dimension_semantics=("parallel",),
            vmem_limit_bytes=budget,
        ),
        cost_estimate=pl.CostEstimate(
            flops=3 * n, transcendentals=0,
            bytes_accessed=(y_hat.dtype.itemsize + y.dtype.itemsize) * n,
        ),
    )(h, t)
    return jnp.sum(parts[:, 0, 0]) / jnp.float32(n)


class LinearRegression:
    """Thin module-parity wrapper (forward / loss) around the Pallas kernels."""

    def __init__(self, num_inputs):
        self.w = jnp.zeros((num_inputs, 1), jnp.float32)
        self.b = jnp.float32(0.0)

    def forward(self, X):
        return linear_regression_forward(X, self.w, self.b)

    def loss(self, y_hat, y):
        return mse_loss(y_hat, y)


if __name__ == "__main__":
    key = jax.random.PRNGKey(0)
    kx, kw, ky = jax.random.split(key, 3)

    batch, num_inputs = 8, 32
    X = jax.random.normal(kx, (batch, num_inputs), dtype=jnp.float32)
    w = jax.random.normal(kw, (num_inputs, 1), dtype=jnp.float32) * 0.1
    b = jnp.float32(0.5)
    y = jax.random.normal(ky, (batch, 1), dtype=jnp.float32)

    # primary paths
    y_hat, loss_fused = linear_regression_forward_and_loss(X, w, b, y)
    loss_only = linear_regression_loss(X, w, b, y)

    # module-parity path: separate forward() and loss()
    model = LinearRegression(num_inputs)
    model.w, model.b = w, b
    y_hat2 = model.forward(X)
    loss2 = model.loss(y_hat2, y)

    jax.block_until_ready((y_hat, loss_fused, loss_only, y_hat2, loss2))

    # correctness checks against plain JAX
    y_hat_ref = X @ w + b
    loss_ref = jnp.mean((y_hat_ref - y) ** 2)
    assert jnp.allclose(y_hat, y_hat_ref, atol=1e-5), "fused forward mismatch"
    assert jnp.allclose(y_hat2, y_hat_ref, atol=1e-5), "forward mismatch"
    assert jnp.allclose(loss_fused, loss_ref, atol=1e-5), "fused loss mismatch"
    assert jnp.allclose(loss_only, loss_ref, atol=1e-5), "loss-only mismatch"
    assert jnp.allclose(loss2, loss_ref, atol=1e-5), "standalone loss mismatch"

    # bf16 X streaming path (halves HBM traffic of the dominant stream)
    y_hat_bf16 = linear_regression_forward(X.astype(jnp.bfloat16), w, b)
    jax.block_until_ready(y_hat_bf16)
    assert jnp.allclose(y_hat_bf16, y_hat_ref, atol=5e-2), "bf16 forward mismatch"

    print("KERNEL_OK")
</pallas_src>

<mosaic_0001>
module attributes {stable_mosaic.version = 11 : i64} {
  func.func @_fwd_loss_kernel(%arg0: i32, %arg1: memref<8x32xf32, #tpu.memory_space<vmem>>, %arg2: memref<1x32xf32, #tpu.memory_space<vmem>>, %arg3: memref<8x1xf32, #tpu.memory_space<vmem>>, %arg4: memref<1xf32, #tpu.memory_space<smem>>, %arg5: memref<8x1xf32, #tpu.memory_space<vmem>>, %arg6: memref<1x8x128xf32, #tpu.memory_space<vmem>>) attributes {dimension_semantics = [#tpu.dimension_semantics<parallel>], iteration_bounds = array<i64: 1>, scalar_prefetch = 0 : i64, scratch_operands = 0 : i64, tpu.core_type = #tpu.core_type<tc>, window_params = [{transform_indices = @transform_0, window_bounds = array<i64: 8, 32>}, {pipeline_mode = #tpu.pipeline_mode<synchronous>, transform_indices = @transform_1, window_bounds = array<i64: 1, 32>}, {transform_indices = @transform_2, window_bounds = array<i64: 8, 1>}, {transform_indices = @transform_3, window_bounds = array<i64: 1>}, {transform_indices = @transform_4, window_bounds = array<i64: 8, 1>}, {transform_indices = @transform_5, window_bounds = array<i64: 1, 8, 128>}]} {
    %c0 = arith.constant 0 : index
    %c0_0 = arith.constant 0 : index
    %0 = vector.load %arg1[%c0, %c0_0] : memref<8x32xf32, #tpu.memory_space<vmem>>, vector<8x32xf32>
    %c0_1 = arith.constant 0 : index
    %c0_2 = arith.constant 0 : index
    %1 = vector.load %arg2[%c0_1, %c0_2] : memref<1x32xf32, #tpu.memory_space<vmem>>, vector<1x32xf32>
    %2 = vector.broadcast %1 : vector<1x32xf32> to vector<8x32xf32>
    %3 = arith.mulf %0, %2 : vector<8x32xf32>
    %cst = arith.constant dense<0.000000e+00> : vector<8xf32>
    %4 = vector.multi_reduction <add>, %3, %cst [1] : vector<8x32xf32> to vector<8xf32>
    %5 = vector.shape_cast %4 : vector<8xf32> to vector<8x1xf32>
    %c0_3 = arith.constant 0 : index
    %6 = memref.load %arg4[%c0_3] : memref<1xf32, #tpu.memory_space<smem>>
    %7 = vector.broadcast %6 : f32 to vector<8x1xf32>
    %8 = arith.addf %5, %7 : vector<8x1xf32>
    %c0_4 = arith.constant 0 : index
    %c0_5 = arith.constant 0 : index
    %9 = vector.load %arg5[%c0_4, %c0_5] : memref<8x1xf32, #tpu.memory_space<vmem>>, vector<8x1xf32>
    tpu.vector_store %arg5[%c0_4, %c0_5], %8 {strides = array<i32>} : memref<8x1xf32, #tpu.memory_space<vmem>>, vector<8x1xf32>,
    %c0_6 = arith.constant 0 : index
    %c0_7 = arith.constant 0 : index
    %10 = vector.load %arg3[%c0_6, %c0_7] : memref<8x1xf32, #tpu.memory_space<vmem>>, vector<8x1xf32>
    %11 = arith.subf %8, %10 : vector<8x1xf32>
    %c8_i32 = arith.constant 8 : i32
    %12 = arith.muli %arg0, %c8_i32 : i32
    %13 = tpu.iota {dimensions = array<i32: 0>} : vector<8x1xi32>
    %14 = vector.broadcast %12 : i32 to vector<8x1xi32>
    %15 = arith.addi %14, %13 : vector<8x1xi32>
    %c8_i32_8 = arith.constant 8 : i32
    %16 = vector.broadcast %c8_i32_8 : i32 to vector<8x1xi32>
    %17 = arith.cmpi slt, %15, %16 : vector<8x1xi32>
    %cst_9 = arith.constant 0.000000e+00 : f32
    %18 = vector.broadcast %cst_9 : f32 to vector<8x1xf32>
    %19 = arith.select %17, %11, %18 : vector<8x1xi1>, vector<8x1xf32>
    %20 = arith.mulf %19, %19 : vector<8x1xf32>
    %21 = vector.shape_cast %20 : vector<8x1xf32> to vector<1x8x1xf32>
    %cst_10 = arith.constant dense<0.000000e+00> : vector<1xf32>
    %22 = vector.multi_reduction <add>, %21, %cst_10 [1, 2] : vector<1x8x1xf32> to vector<1xf32>
    %23 = vector.shape_cast %22 : vector<1xf32> to vector<1x1x1xf32>
    %24 = vector.extract %23[0, 0, 0] : f32 from vector<1x1x1xf32>
    %25 = vector.broadcast %24 : f32 to vector<1x8x128xf32>
    %c0_11 = arith.constant 0 : index
    %c0_12 = arith.constant 0 : index
    %c0_13 = arith.constant 0 : index
    %26 = vector.load %arg6[%c0_11, %c0_12, %c0_13] : memref<1x8x128xf32, #tpu.memory_space<vmem>>, vector<1x8x128xf32>
    tpu.vector_store %arg6[%c0_11, %c0_12, %c0_13], %25 {strides = array<i32>} : memref<1x8x128xf32, #tpu.memory_space<vmem>>, vector<1x8x128xf32>,
    return
  }
  func.func @transform_0(%arg0: i32) -> (i32, i32) {
    %c0_i32 = arith.constant 0 : i32
    %c0_i32_0 = arith.constant 0 : i32
    return %arg0, %c0_i32 : i32, i32
  }
  func.func @transform_1(%arg0: i32) -> (i32, i32) {
    %c0_i32 = arith.constant 0 : i32
    %c0_i32_0 = arith.constant 0 : i32
    %c0_i32_1 = arith.constant 0 : i32
    return %c0_i32, %c0_i32_0 : i32, i32
  }
  func.func @transform_2(%arg0: i32) -> (i32, i32) {
    %c0_i32 = arith.constant 0 : i32
    %c0_i32_0 = arith.constant 0 : i32
    return %arg0, %c0_i32 : i32, i32
  }
  func.func @transform_3(%arg0: i32) -> i32 {
    %c0_i32 = arith.constant 0 : i32
    %c0_i32_0 = arith.constant 0 : i32
    return %c0_i32 : i32
  }
  func.func @transform_4(%arg0: i32) -> (i32, i32) {
    %c0_i32 = arith.constant 0 : i32
    %c0_i32_0 = arith.constant 0 : i32
    return %arg0, %c0_i32 : i32, i32
  }
  func.func @transform_5(%arg0: i32) -> (i32, i32, i32) {
    %c0_i32 = arith.constant 0 : i32
    %c0_i32_0 = arith.constant 0 : i32
    %c0_i32_1 = arith.constant 0 : i32
    return %arg0, %c0_i32, %c0_i32_0 : i32, i32, i32
  }
}

</mosaic_0001>

<bundles_post_ra>
// kernel: tpu_custom_call.1
= control target key start
LH: loop header
LB: loop body
LE: loop exit
PB: predicated region body
PF: predicated region fallthrough
CT: control target
= control target key end

     0   :  { %vm30_vm0 = vcmask 261120   ;;  %s165_s0 = inlined_call_operand.vmem [shape: f32[8,32], index: 0, kind: input, shape index: {}]   ;;  %s166_s1 = inlined_call_operand.vmem [shape: f32[1,32], index: 1, kind: input, shape index: {}]   ;;  %s167_s2 = inlined_call_operand.vmem [shape: f32[8,1], index: 2, kind: input, shape index: {}]   ;;  %s168_s3 = inlined_call_operand.<no memory space> [shape: f32[1], index: 3, kind: input, shape index: {}]   ;;  %s169_s4 = inlined_call_operand.vmem [shape: f32[8,1], index: 4, kind: output, shape index: {0}]   ;;  %s170_s5 = inlined_call_operand.hbm [shape: f32[1,8,128], index: 5, kind: output, shape index: {1}]  }
   0x1   :  { %v21_v0 = vld [vmem:[%s165_s0] sm:$0xff] }
   0x2   :  { %v79_v1 = vld [vmem:[%s166_s1] ss:$0 sm:$0xff] }
   0x3   :  { %v29_v2 = vmul.f32 %v79_v1, %v21_v0 }
   0x4   :  { %12 = vsyncpa [#allocation4], 0  ;;  %v35_v4 = vstv %s168_s3  ;;  %v39_v5 = vld [vmem:[%s167_s2] sm:$0xff]  ;;  %vm37_vm1 = vcmask 7168   ;;  %s107_s1 = smov [#allocation3]  }
   0x5   :  { %v31_v3 = vsel %vm30_vm0, %v29_v2, 0.0  ;;  %s69_s2 = sshll.u32 %s107_s1, 4  ;;  %s70_s2 = int_to_ptr.vmem [resolvable:$true] %s69_s2 }
   0x6   :  { %32 = vadd.xlane.f32.xlu0 %v31_v3  ;;  %s83_s27 = scalar_lea.vmem %s70_s2, 128  ;;  %p88_p1 = scmp.lt.s32.totalorder %s70_s2, %s70_s2 }
   0x7   :  { %p84_p0 = scmp.ne.s32.totalorder %s70_s2, %s83_s27  ;;  %p89_p2 = scmp.lt.s32.totalorder %s83_s27, %s83_s27 }
   0x9   :  { %p90_p3 = por %p89_p2, %p88_p1 }
   0xb   :  { %p91_p4 = pnand %p90_p3, %p84_p0 }
  0x93   :  { %v33_v6 = vpop.xlane.xlu0 %32 }
  0x94   :  { %v36_v7 = vadd.f32 %v35_v4, %v33_v6 }
  0x96   :  { %v40_v8 = vsub.f32 %v36_v7, %v39_v5  ;;  %38 = vst.msk [vmem:[%s169_s4] sm:$0xff] %vm37_vm1, %v36_v7 }
  0x98   :  { %v48_v9 = vmul.f32 %v40_v8, %v40_v8 }
  0x9a   :  { %v49_v10 = vsel %vm37_vm1, %v48_v9, 0.0 }
  0x9b   :  { %50 = vadd.xlane.f32.xlu0 %v49_v10 }
 0x128   :  { %v51_v11 = vpop.xlane.xlu0 %50 }
 0x129   :  { %v52_v12 = vrot.slane %v51_v11, 4 }
 0x12b   :  { %v53_v13 = vadd.f32 %v52_v12, %v51_v11 }
 0x12d   :  { %v54_v14 = vrot.slane %v53_v13, 2 }
 0x12f   :  { %v55_v15 = vadd.f32 %v54_v14, %v53_v13 }
 0x131   :  { %v56_v16 = vrot.slane %v55_v15, 1 }
 0x133   :  { %v57_v17 = vadd.f32 %v56_v16, %v55_v15 }
 0x135   :  { %80 = vpush %v57_v17 }
 0x166   :  { %s81_s3 = spop %80 }
 0x167   :  { %v59_v18 = vstv %s81_s3 }
 0x168   :  { %60 = vst [vmem:[#allocation3] sm:$0xff] %v59_v18 }
 0x169   :  { %94 = shalt.err (!%p91_p4)
}
 0x16a   :  { %s95_s29 = scalar_lea.hbm %s170_s5, 128 }
 0x16b   :  { %p96_p5 = scmp.ne.s32.totalorder %s170_s5, %s95_s29  ;;  %p99_p6 = scmp.lt.u32.totalorder %s95_s29, %s170_s5 }
 0x16d   :  { %p101_p7 = pnand %p99_p6, %p96_p5 }
 0x16f   :  { %104 = shalt.err (!%p101_p7)
}
 0x170   :  { %72 = dma.vmem_to_hbm [thread:$0]  %s70_s2, 128, %s170_s5, [#allocation4]  }
 0x171   :  { %105 = dma.done.wait [#allocation4], 128  }
 0x172   :  { %106 = vsyncadd [#allocation4], 4294967168 }
 0x173   :  { %78 = vsyncpa [#allocation4], 1 }

</bundles_post_ra>
